<compile_context>
chip_gen: v6e
topology: v6e:2x2x1
jax: 0.10.0
libtpu: 0.0.40
codegen_flags: <defaults>
</compile_context>

<pallas_src>
import jax
import jax.numpy as jnp
from jax import lax
from jax.experimental import pallas as pl
from jax.experimental.pallas import tpu as pltpu

EPS = 1e-5
PREC_HI = lax.Precision.HIGHEST  # only the tiny wrapper-side MLP (matches torch f32)


def convblock_forward(x_nchw, v, params):
    """ConvBlock forward.  NCHW in, NCHW out (PyTorch convention).

    params are torch-native shapes:
      mlp_w1 (Cin,T), mlp_b1 (Cin,), mlp_w2 (Cin,Cin), mlp_b2 (Cin,)
      conv{1,2}_w (Cout,Cin,3,3)/(Cout,Cout,3,3), conv{1,2}_b (Cout,)
      bn{1,2}_g / bn{1,2}_b (Cout,)
    """
    N, Cin, H, W = x_nchw.shape
    Cout = params["conv1_w"].shape[0]
    HW = H * W
    R = N * HW
    INV_R = 1.0 / R
    Cin_p = ((Cin + 7) // 8) * 8          # pad so im2col concat pieces are sublane tiles

    # ---- tiny time-embedding MLP in the wrapper (perf review item 10) ----
    h = jnp.maximum(
        jnp.dot(v, params["mlp_w1"].T, precision=PREC_HI) + params["mlp_b1"], 0.0)
    vmlp = jnp.dot(h, params["mlp_w2"].T, precision=PREC_HI) + params["mlp_b2"]  # (N, Cin)

    # channels-first, flattened spatial+batch in the lane axis
    x_cf = jnp.transpose(x_nchw, (1, 0, 2, 3)).reshape(Cin, R).astype(jnp.float32)
    vadd = jnp.broadcast_to(vmlp.T.astype(jnp.float32)[:, :, None],
                            (Cin, N, HW)).reshape(Cin, R)

    def pad_rows(a):
        return jnp.pad(a, ((0, Cin_p - a.shape[0]), (0, 0)))

    x_cf_p = pad_rows(x_cf)
    vadd_p = pad_rows(vadd)

    # ---- 3x3 tap offsets + precomputed border-validity masks (9, R) ----
    TAPS = [(dh, dw) for dh in (-1, 0, 1) for dw in (-1, 0, 1)]
    r = jnp.arange(R, dtype=jnp.int32)
    w_pos = r % W
    h_pos = (r // W) % H
    mask_rows = []
    for dh, dw in TAPS:
        hp = h_pos + dh
        wp = w_pos + dw
        valid = (hp >= 0) & (hp < H) & (wp >= 0) & (wp < W)
        mask_rows.append(valid.astype(jnp.float32))
    mask9 = jnp.stack(mask_rows, axis=0)                     # (9, R) f32

    def pack_conv(w, ci_pad):
        # torch (Cout, Ci, kh, kw) -> (Cout, 9*ci_pad) bf16; K idx = (kh*3+kw)*ci_pad + ci
        co, ci = w.shape[0], w.shape[1]
        w_t = jnp.transpose(w, (0, 2, 3, 1)).astype(jnp.float32)       # (co, 3, 3, ci)
        w_t = jnp.pad(w_t, ((0, 0), (0, 0), (0, 0), (0, ci_pad - ci)))
        return w_t.reshape(co, 9 * ci_pad).astype(jnp.bfloat16)        # pre-cast (item 5)

    def as_col(p):
        return p.reshape(-1, 1).astype(jnp.float32)

    wc1 = pack_conv(params["conv1_w"], Cin_p)               # (Cout, 9*Cin_p)  bf16
    wc2 = pack_conv(params["conv2_w"], Cout)                # (Cout, 9*Cout)   bf16

    args = (x_cf_p, vadd_p, mask9,
            wc1, as_col(params["bn1_g"]), as_col(params["bn1_b"]),
            wc2, as_col(params["bn2_g"]), as_col(params["bn2_b"]))

    def kernel(x_ref, vadd_ref, m_ref, wc1_ref, g1_ref, be1_ref,
               wc2_ref, g2_ref, be2_ref, o_ref):
        m = m_ref[...]                                       # (9, R) f32, loaded once

        def im2col(y):
            # y: (c, R) f32 -> (9*c, R) bf16, built entirely in registers.
            # Each tap: lane-roll of the flattened image (XLU) + border-mask
            # multiply (zero padding), f32 throughout, one bf16 cast at the end.
            taps = []
            for k, (dh, dw) in enumerate(TAPS):
                off = dh * W + dw
                shifted = pltpu.roll(y, shift=(-off) % R, axis=1) if off != 0 else y
                taps.append(shifted * m[k:k + 1, :])
            return jnp.concatenate(taps, axis=0).astype(jnp.bfloat16)

        def conv_bn_relu(col, wc_ref, g_ref, be_ref):
            # one fused MXU matmul: (Cout, 9c) @ (9c, R), bf16 in / f32 acc
            acc = jnp.dot(wc_ref[...], col,
                          preferred_element_type=jnp.float32)          # (Cout, R)
            # training-mode BatchNorm, one-pass batch stats (biased variance).
            # Conv bias omitted: cancelled exactly by the mean subtraction.
            mean = jnp.sum(acc, axis=1, keepdims=True) * INV_R         # (Cout, 1)
            ex2 = jnp.sum(acc * acc, axis=1, keepdims=True) * INV_R
            var = jnp.maximum(ex2 - mean * mean, 0.0)
            scale = g_ref[...] * lax.rsqrt(var + EPS)                  # fused BN scale
            shift = be_ref[...] - mean * scale
            return jnp.maximum(acc * scale + shift, 0.0)

        y0 = x_ref[...] + vadd_ref[...]                                # (Cin_p, R)
        y1 = conv_bn_relu(im2col(y0), wc1_ref, g1_ref, be1_ref)        # (Cout, R)
        o_ref[...] = conv_bn_relu(im2col(y1), wc2_ref, g2_ref, be2_ref)  # lane-dense store

    vmem = pl.BlockSpec(memory_space=pltpu.MemorySpace.VMEM)
    out_cf = pl.pallas_call(
        kernel,
        out_shape=jax.ShapeDtypeStruct((Cout, R), jnp.float32),
        in_specs=[vmem] * len(args),
        out_specs=vmem,
    )(*args)

    return jnp.transpose(out_cf.reshape(Cout, N, H, W), (1, 0, 2, 3))


# ------------------------- pure-JAX reference (NCHW) -------------------------
def ref_forward(x, v, p):
    # torch Linear: y = x @ W.T + b
    h = jnp.maximum(jnp.dot(v, p["mlp_w1"].T, precision=PREC_HI) + p["mlp_b1"], 0.0)
    vm = jnp.dot(h, p["mlp_w2"].T, precision=PREC_HI) + p["mlp_b2"]
    y = x + vm[:, :, None, None]

    def conv(x, w, b):
        # bf16 inputs + f32 accumulation, mirroring the kernel's MXU precision
        out = lax.conv_general_dilated(
            x.astype(jnp.bfloat16), w.astype(jnp.bfloat16),
            (1, 1), ((1, 1), (1, 1)),
            dimension_numbers=("NCHW", "OIHW", "NCHW"),
            preferred_element_type=jnp.float32)
        return out + b[None, :, None, None]

    def bn_relu(y, g, be):
        mean = y.mean(axis=(0, 2, 3), keepdims=True)
        var = ((y - mean) ** 2).mean(axis=(0, 2, 3), keepdims=True)
        yn = (y - mean) / jnp.sqrt(var + EPS)
        return jnp.maximum(yn * g[None, :, None, None] + be[None, :, None, None], 0.0)

    y = bn_relu(conv(y, p["conv1_w"], p["conv1_b"]), p["bn1_g"], p["bn1_b"])
    y = bn_relu(conv(y, p["conv2_w"], p["conv2_b"]), p["bn2_g"], p["bn2_b"])
    return y


if __name__ == "__main__":
    N, Cin, Cout, H, W, T = 2, 4, 8, 16, 16, 32

    key = jax.random.PRNGKey(0)
    ks = jax.random.split(key, 14)
    f32 = jnp.float32

    params = {
        # MLP: Linear(T, Cin) -> ReLU -> Linear(Cin, Cin)   (torch weight = (out, in))
        "mlp_w1": 0.2 * jax.random.normal(ks[0], (Cin, T), f32),
        "mlp_b1": 0.1 * jax.random.normal(ks[1], (Cin,), f32),
        "mlp_w2": 0.2 * jax.random.normal(ks[2], (Cin, Cin), f32),
        "mlp_b2": 0.1 * jax.random.normal(ks[3], (Cin,), f32),
        # Conv1 (Cin -> Cout) + BN1
        "conv1_w": 0.2 * jax.random.normal(ks[4], (Cout, Cin, 3, 3), f32),
        "conv1_b": 0.1 * jax.random.normal(ks[5], (Cout,), f32),
        "bn1_g": 1.0 + 0.1 * jax.random.normal(ks[6], (Cout,), f32),
        "bn1_b": 0.1 * jax.random.normal(ks[7], (Cout,), f32),
        # Conv2 (Cout -> Cout) + BN2
        "conv2_w": 0.2 * jax.random.normal(ks[8], (Cout, Cout, 3, 3), f32),
        "conv2_b": 0.1 * jax.random.normal(ks[9], (Cout,), f32),
        "bn2_g": 1.0 + 0.1 * jax.random.normal(ks[10], (Cout,), f32),
        "bn2_b": 0.1 * jax.random.normal(ks[11], (Cout,), f32),
    }

    x = jax.random.normal(ks[12], (N, Cin, H, W), f32)   # NCHW, PyTorch convention
    v = jax.random.normal(ks[13], (N, T), f32)

    out = jax.block_until_ready(convblock_forward(x, v, params))
    ref = jax.block_until_ready(ref_forward(x, v, params))

    assert out.shape == (N, Cout, H, W), out.shape
    max_err = float(jnp.max(jnp.abs(out - ref)))
    # atol covers bf16-input MXU rounding (intentional) + one-pass BN variance
    assert jnp.allclose(out, ref, rtol=1e-3, atol=5e-3), max_err

    print("KERNEL_OK")
</pallas_src>

<mosaic_0001>
module attributes {stable_mosaic.version = 11 : i64} {
  func.func @kernel(%arg0: memref<8x512xf32, #tpu.memory_space<vmem>>, %arg1: memref<8x512xf32, #tpu.memory_space<vmem>>, %arg2: memref<9x512xf32, #tpu.memory_space<vmem>>, %arg3: memref<8x72xbf16, #tpu.memory_space<vmem>>, %arg4: memref<8x1xf32, #tpu.memory_space<vmem>>, %arg5: memref<8x1xf32, #tpu.memory_space<vmem>>, %arg6: memref<8x72xbf16, #tpu.memory_space<vmem>>, %arg7: memref<8x1xf32, #tpu.memory_space<vmem>>, %arg8: memref<8x1xf32, #tpu.memory_space<vmem>>, %arg9: memref<8x512xf32, #tpu.memory_space<vmem>>) attributes {dimension_semantics = [], scalar_prefetch = 0 : i64, scratch_operands = 0 : i64, tpu.core_type = #tpu.core_type<tc>} {
    %c0 = arith.constant 0 : index
    %c0_0 = arith.constant 0 : index
    %0 = vector.load %arg2[%c0, %c0_0] : memref<9x512xf32, #tpu.memory_space<vmem>>, vector<9x512xf32>
    %c0_1 = arith.constant 0 : index
    %c0_2 = arith.constant 0 : index
    %1 = vector.load %arg0[%c0_1, %c0_2] : memref<8x512xf32, #tpu.memory_space<vmem>>, vector<8x512xf32>
    %c0_3 = arith.constant 0 : index
    %c0_4 = arith.constant 0 : index
    %2 = vector.load %arg1[%c0_3, %c0_4] : memref<8x512xf32, #tpu.memory_space<vmem>>, vector<8x512xf32>
    %3 = arith.addf %1, %2 : vector<8x512xf32>
    %c17_i32 = arith.constant 17 : i32
    %4 = tpu.dynamic_rotate %3 by %c17_i32 dim 1 : vector<8x512xf32>, i32 -> vector<8x512xf32>
    %5 = vector.extract_strided_slice %0 {offsets = [0, 0], sizes = [1, 512], strides = [1, 1]} : vector<9x512xf32> to vector<1x512xf32>
    %6 = vector.broadcast %5 : vector<1x512xf32> to vector<8x512xf32>
    %7 = arith.mulf %4, %6 : vector<8x512xf32>
    %c16_i32 = arith.constant 16 : i32
    %8 = tpu.dynamic_rotate %3 by %c16_i32 dim 1 : vector<8x512xf32>, i32 -> vector<8x512xf32>
    %9 = vector.extract_strided_slice %0 {offsets = [1, 0], sizes = [1, 512], strides = [1, 1]} : vector<9x512xf32> to vector<1x512xf32>
    %10 = vector.broadcast %9 : vector<1x512xf32> to vector<8x512xf32>
    %11 = arith.mulf %8, %10 : vector<8x512xf32>
    %c15_i32 = arith.constant 15 : i32
    %12 = tpu.dynamic_rotate %3 by %c15_i32 dim 1 : vector<8x512xf32>, i32 -> vector<8x512xf32>
    %13 = vector.extract_strided_slice %0 {offsets = [2, 0], sizes = [1, 512], strides = [1, 1]} : vector<9x512xf32> to vector<1x512xf32>
    %14 = vector.broadcast %13 : vector<1x512xf32> to vector<8x512xf32>
    %15 = arith.mulf %12, %14 : vector<8x512xf32>
    %c1_i32 = arith.constant 1 : i32
    %16 = tpu.dynamic_rotate %3 by %c1_i32 dim 1 : vector<8x512xf32>, i32 -> vector<8x512xf32>
    %17 = vector.extract_strided_slice %0 {offsets = [3, 0], sizes = [1, 512], strides = [1, 1]} : vector<9x512xf32> to vector<1x512xf32>
    %18 = vector.broadcast %17 : vector<1x512xf32> to vector<8x512xf32>
    %19 = arith.mulf %16, %18 : vector<8x512xf32>
    %20 = vector.extract_strided_slice %0 {offsets = [4, 0], sizes = [1, 512], strides = [1, 1]} : vector<9x512xf32> to vector<1x512xf32>
    %21 = vector.broadcast %20 : vector<1x512xf32> to vector<8x512xf32>
    %22 = arith.mulf %3, %21 : vector<8x512xf32>
    %c511_i32 = arith.constant 511 : i32
    %23 = tpu.dynamic_rotate %3 by %c511_i32 dim 1 : vector<8x512xf32>, i32 -> vector<8x512xf32>
    %24 = vector.extract_strided_slice %0 {offsets = [5, 0], sizes = [1, 512], strides = [1, 1]} : vector<9x512xf32> to vector<1x512xf32>
    %25 = vector.broadcast %24 : vector<1x512xf32> to vector<8x512xf32>
    %26 = arith.mulf %23, %25 : vector<8x512xf32>
    %c497_i32 = arith.constant 497 : i32
    %27 = tpu.dynamic_rotate %3 by %c497_i32 dim 1 : vector<8x512xf32>, i32 -> vector<8x512xf32>
    %28 = vector.extract_strided_slice %0 {offsets = [6, 0], sizes = [1, 512], strides = [1, 1]} : vector<9x512xf32> to vector<1x512xf32>
    %29 = vector.broadcast %28 : vector<1x512xf32> to vector<8x512xf32>
    %30 = arith.mulf %27, %29 : vector<8x512xf32>
    %c496_i32 = arith.constant 496 : i32
    %31 = tpu.dynamic_rotate %3 by %c496_i32 dim 1 : vector<8x512xf32>, i32 -> vector<8x512xf32>
    %32 = vector.extract_strided_slice %0 {offsets = [7, 0], sizes = [1, 512], strides = [1, 1]} : vector<9x512xf32> to vector<1x512xf32>
    %33 = vector.broadcast %32 : vector<1x512xf32> to vector<8x512xf32>
    %34 = arith.mulf %31, %33 : vector<8x512xf32>
    %c495_i32 = arith.constant 495 : i32
    %35 = tpu.dynamic_rotate %3 by %c495_i32 dim 1 : vector<8x512xf32>, i32 -> vector<8x512xf32>
    %36 = vector.extract_strided_slice %0 {offsets = [8, 0], sizes = [1, 512], strides = [1, 1]} : vector<9x512xf32> to vector<1x512xf32>
    %37 = vector.broadcast %36 : vector<1x512xf32> to vector<8x512xf32>
    %38 = arith.mulf %35, %37 : vector<8x512xf32>
    %39 = tpu.concatenate %7, %11, %15, %19, %22, %26, %30, %34, %38 in 0 : vector<8x512xf32>, vector<8x512xf32>, vector<8x512xf32>, vector<8x512xf32>, vector<8x512xf32>, vector<8x512xf32>, vector<8x512xf32>, vector<8x512xf32>, vector<8x512xf32> -> vector<72x512xf32>
    %40 = arith.truncf %39 : vector<72x512xf32> to vector<72x512xbf16>
    %c0_5 = arith.constant 0 : index
    %c0_6 = arith.constant 0 : index
    %41 = vector.load %arg3[%c0_5, %c0_6] : memref<8x72xbf16, #tpu.memory_space<vmem>>, vector<8x72xbf16>
    %cst = arith.constant dense<0.000000e+00> : vector<8x512xf32>
    %42 = tpu.matmul %41, %40, %cst {dimension_numbers = #tpu.dot_dimension_numbers<[1], [0], [0], [1], [0, 0, 1, 1], [], []>} : vector<8x72xbf16>, vector<72x512xbf16>, vector<8x512xf32> -> vector<8x512xf32>
    %cst_7 = arith.constant dense<0.000000e+00> : vector<8xf32>
    %43 = vector.multi_reduction <add>, %42, %cst_7 [1] : vector<8x512xf32> to vector<8xf32>
    %44 = vector.shape_cast %43 : vector<8xf32> to vector<8x1xf32>
    %cst_8 = arith.constant 0.001953125 : f32
    %45 = vector.broadcast %cst_8 : f32 to vector<8x1xf32>
    %46 = arith.mulf %44, %45 : vector<8x1xf32>
    %47 = arith.mulf %42, %42 : vector<8x512xf32>
    %cst_9 = arith.constant dense<0.000000e+00> : vector<8xf32>
    %48 = vector.multi_reduction <add>, %47, %cst_9 [1] : vector<8x512xf32> to vector<8xf32>
    %49 = vector.shape_cast %48 : vector<8xf32> to vector<8x1xf32>
    %cst_10 = arith.constant 0.001953125 : f32
    %50 = vector.broadcast %cst_10 : f32 to vector<8x1xf32>
    %51 = arith.mulf %49, %50 : vector<8x1xf32>
    %52 = arith.mulf %46, %46 : vector<8x1xf32>
    %53 = arith.subf %51, %52 : vector<8x1xf32>
    %cst_11 = arith.constant 0.000000e+00 : f32
    %54 = vector.broadcast %cst_11 : f32 to vector<8x1xf32>
    %55 = arith.maximumf %53, %54 : vector<8x1xf32>
    %c0_12 = arith.constant 0 : index
    %c0_13 = arith.constant 0 : index
    %56 = vector.load %arg4[%c0_12, %c0_13] : memref<8x1xf32, #tpu.memory_space<vmem>>, vector<8x1xf32>
    %cst_14 = arith.constant 9.99999974E-6 : f32
    %57 = vector.broadcast %cst_14 : f32 to vector<8x1xf32>
    %58 = arith.addf %55, %57 : vector<8x1xf32>
    %59 = math.rsqrt %58 : vector<8x1xf32>
    %60 = arith.mulf %56, %59 : vector<8x1xf32>
    %c0_15 = arith.constant 0 : index
    %c0_16 = arith.constant 0 : index
    %61 = vector.load %arg5[%c0_15, %c0_16] : memref<8x1xf32, #tpu.memory_space<vmem>>, vector<8x1xf32>
    %62 = arith.mulf %46, %60 : vector<8x1xf32>
    %63 = arith.subf %61, %62 : vector<8x1xf32>
    %64 = vector.broadcast %60 : vector<8x1xf32> to vector<8x512xf32>
    %65 = arith.mulf %42, %64 : vector<8x512xf32>
    %66 = vector.broadcast %63 : vector<8x1xf32> to vector<8x512xf32>
    %67 = arith.addf %65, %66 : vector<8x512xf32>
    %cst_17 = arith.constant 0.000000e+00 : f32
    %68 = vector.broadcast %cst_17 : f32 to vector<8x512xf32>
    %69 = arith.maximumf %67, %68 : vector<8x512xf32>
    %c17_i32_18 = arith.constant 17 : i32
    %70 = tpu.dynamic_rotate %69 by %c17_i32_18 dim 1 : vector<8x512xf32>, i32 -> vector<8x512xf32>
    %71 = vector.extract_strided_slice %0 {offsets = [0, 0], sizes = [1, 512], strides = [1, 1]} : vector<9x512xf32> to vector<1x512xf32>
    %72 = vector.broadcast %71 : vector<1x512xf32> to vector<8x512xf32>
    %73 = arith.mulf %70, %72 : vector<8x512xf32>
    %c16_i32_19 = arith.constant 16 : i32
    %74 = tpu.dynamic_rotate %69 by %c16_i32_19 dim 1 : vector<8x512xf32>, i32 -> vector<8x512xf32>
    %75 = vector.extract_strided_slice %0 {offsets = [1, 0], sizes = [1, 512], strides = [1, 1]} : vector<9x512xf32> to vector<1x512xf32>
    %76 = vector.broadcast %75 : vector<1x512xf32> to vector<8x512xf32>
    %77 = arith.mulf %74, %76 : vector<8x512xf32>
    %c15_i32_20 = arith.constant 15 : i32
    %78 = tpu.dynamic_rotate %69 by %c15_i32_20 dim 1 : vector<8x512xf32>, i32 -> vector<8x512xf32>
    %79 = vector.extract_strided_slice %0 {offsets = [2, 0], sizes = [1, 512], strides = [1, 1]} : vector<9x512xf32> to vector<1x512xf32>
    %80 = vector.broadcast %79 : vector<1x512xf32> to vector<8x512xf32>
    %81 = arith.mulf %78, %80 : vector<8x512xf32>
    %c1_i32_21 = arith.constant 1 : i32
    %82 = tpu.dynamic_rotate %69 by %c1_i32_21 dim 1 : vector<8x512xf32>, i32 -> vector<8x512xf32>
    %83 = vector.extract_strided_slice %0 {offsets = [3, 0], sizes = [1, 512], strides = [1, 1]} : vector<9x512xf32> to vector<1x512xf32>
    %84 = vector.broadcast %83 : vector<1x512xf32> to vector<8x512xf32>
    %85 = arith.mulf %82, %84 : vector<8x512xf32>
    %86 = vector.extract_strided_slice %0 {offsets = [4, 0], sizes = [1, 512], strides = [1, 1]} : vector<9x512xf32> to vector<1x512xf32>
    %87 = vector.broadcast %86 : vector<1x512xf32> to vector<8x512xf32>
    %88 = arith.mulf %69, %87 : vector<8x512xf32>
    %c511_i32_22 = arith.constant 511 : i32
    %89 = tpu.dynamic_rotate %69 by %c511_i32_22 dim 1 : vector<8x512xf32>, i32 -> vector<8x512xf32>
    %90 = vector.extract_strided_slice %0 {offsets = [5, 0], sizes = [1, 512], strides = [1, 1]} : vector<9x512xf32> to vector<1x512xf32>
    %91 = vector.broadcast %90 : vector<1x512xf32> to vector<8x512xf32>
    %92 = arith.mulf %89, %91 : vector<8x512xf32>
    %c497_i32_23 = arith.constant 497 : i32
    %93 = tpu.dynamic_rotate %69 by %c497_i32_23 dim 1 : vector<8x512xf32>, i32 -> vector<8x512xf32>
    %94 = vector.extract_strided_slice %0 {offsets = [6, 0], sizes = [1, 512], strides = [1, 1]} : vector<9x512xf32> to vector<1x512xf32>
    %95 = vector.broadcast %94 : vector<1x512xf32> to vector<8x512xf32>
    %96 = arith.mulf %93, %95 : vector<8x512xf32>
    %c496_i32_24 = arith.constant 496 : i32
    %97 = tpu.dynamic_rotate %69 by %c496_i32_24 dim 1 : vector<8x512xf32>, i32 -> vector<8x512xf32>
    %98 = vector.extract_strided_slice %0 {offsets = [7, 0], sizes = [1, 512], strides = [1, 1]} : vector<9x512xf32> to vector<1x512xf32>
    %99 = vector.broadcast %98 : vector<1x512xf32> to vector<8x512xf32>
    %100 = arith.mulf %97, %99 : vector<8x512xf32>
    %c495_i32_25 = arith.constant 495 : i32
    %101 = tpu.dynamic_rotate %69 by %c495_i32_25 dim 1 : vector<8x512xf32>, i32 -> vector<8x512xf32>
    %102 = vector.extract_strided_slice %0 {offsets = [8, 0], sizes = [1, 512], strides = [1, 1]} : vector<9x512xf32> to vector<1x512xf32>
    %103 = vector.broadcast %102 : vector<1x512xf32> to vector<8x512xf32>
    %104 = arith.mulf %101, %103 : vector<8x512xf32>
    %105 = tpu.concatenate %73, %77, %81, %85, %88, %92, %96, %100, %104 in 0 : vector<8x512xf32>, vector<8x512xf32>, vector<8x512xf32>, vector<8x512xf32>, vector<8x512xf32>, vector<8x512xf32>, vector<8x512xf32>, vector<8x512xf32>, vector<8x512xf32> -> vector<72x512xf32>
    %106 = arith.truncf %105 : vector<72x512xf32> to vector<72x512xbf16>
    %c0_26 = arith.constant 0 : index
    %c0_27 = arith.constant 0 : index
    %107 = vector.load %arg6[%c0_26, %c0_27] : memref<8x72xbf16, #tpu.memory_space<vmem>>, vector<8x72xbf16>
    %cst_28 = arith.constant dense<0.000000e+00> : vector<8x512xf32>
    %108 = tpu.matmul %107, %106, %cst_28 {dimension_numbers = #tpu.dot_dimension_numbers<[1], [0], [0], [1], [0, 0, 1, 1], [], []>} : vector<8x72xbf16>, vector<72x512xbf16>, vector<8x512xf32> -> vector<8x512xf32>
    %cst_29 = arith.constant dense<0.000000e+00> : vector<8xf32>
    %109 = vector.multi_reduction <add>, %108, %cst_29 [1] : vector<8x512xf32> to vector<8xf32>
    %110 = vector.shape_cast %109 : vector<8xf32> to vector<8x1xf32>
    %cst_30 = arith.constant 0.001953125 : f32
    %111 = vector.broadcast %cst_30 : f32 to vector<8x1xf32>
    %112 = arith.mulf %110, %111 : vector<8x1xf32>
    %113 = arith.mulf %108, %108 : vector<8x512xf32>
    %cst_31 = arith.constant dense<0.000000e+00> : vector<8xf32>
    %114 = vector.multi_reduction <add>, %113, %cst_31 [1] : vector<8x512xf32> to vector<8xf32>
    %115 = vector.shape_cast %114 : vector<8xf32> to vector<8x1xf32>
    %cst_32 = arith.constant 0.001953125 : f32
    %116 = vector.broadcast %cst_32 : f32 to vector<8x1xf32>
    %117 = arith.mulf %115, %116 : vector<8x1xf32>
    %118 = arith.mulf %112, %112 : vector<8x1xf32>
    %119 = arith.subf %117, %118 : vector<8x1xf32>
    %cst_33 = arith.constant 0.000000e+00 : f32
    %120 = vector.broadcast %cst_33 : f32 to vector<8x1xf32>
    %121 = arith.maximumf %119, %120 : vector<8x1xf32>
    %c0_34 = arith.constant 0 : index
    %c0_35 = arith.constant 0 : index
    %122 = vector.load %arg7[%c0_34, %c0_35] : memref<8x1xf32, #tpu.memory_space<vmem>>, vector<8x1xf32>
    %cst_36 = arith.constant 9.99999974E-6 : f32
    %123 = vector.broadcast %cst_36 : f32 to vector<8x1xf32>
    %124 = arith.addf %121, %123 : vector<8x1xf32>
    %125 = math.rsqrt %124 : vector<8x1xf32>
    %126 = arith.mulf %122, %125 : vector<8x1xf32>
    %c0_37 = arith.constant 0 : index
    %c0_38 = arith.constant 0 : index
    %127 = vector.load %arg8[%c0_37, %c0_38] : memref<8x1xf32, #tpu.memory_space<vmem>>, vector<8x1xf32>
    %128 = arith.mulf %112, %126 : vector<8x1xf32>
    %129 = arith.subf %127, %128 : vector<8x1xf32>
    %130 = vector.broadcast %126 : vector<8x1xf32> to vector<8x512xf32>
    %131 = arith.mulf %108, %130 : vector<8x512xf32>
    %132 = vector.broadcast %129 : vector<8x1xf32> to vector<8x512xf32>
    %133 = arith.addf %131, %132 : vector<8x512xf32>
    %cst_39 = arith.constant 0.000000e+00 : f32
    %134 = vector.broadcast %cst_39 : f32 to vector<8x512xf32>
    %135 = arith.maximumf %133, %134 : vector<8x512xf32>
    %c0_40 = arith.constant 0 : index
    %c0_41 = arith.constant 0 : index
    %136 = vector.load %arg9[%c0_40, %c0_41] : memref<8x512xf32, #tpu.memory_space<vmem>>, vector<8x512xf32>
    tpu.vector_store %arg9[%c0_40, %c0_41], %135 {strides = array<i32>} : memref<8x512xf32, #tpu.memory_space<vmem>>, vector<8x512xf32>,
    return
  }
}

</mosaic_0001>

<bundles_post_ra>
// kernel: tpu_custom_call.1
= control target key start
LH: loop header
LB: loop body
LE: loop exit
PB: predicated region body
PF: predicated region fallthrough
CT: control target
= control target key end

     0   :  { %14 = vsyncpa [#allocation3], 0  ;;  %s1577_s0 = inlined_call_operand.vmem [shape: f32[8,512], index: 0, kind: input, shape index: {}]   ;;  %s1578_s1 = inlined_call_operand.hbm [shape: f32[8,512], index: 1, kind: input, shape index: {}]   ;;  %s1579_s2 = inlined_call_operand.hbm [shape: f32[9,512], index: 2, kind: input, shape index: {}]   ;;  %s1580_s3 = inlined_call_operand.vmem [shape: bf16[8,72], index: 3, kind: input, shape index: {}]   ;;  %s1581_s4 = inlined_call_operand.vmem [shape: f32[8,1], index: 4, kind: input, shape index: {}]   ;;  %s1582_s5 = inlined_call_operand.vmem [shape: f32[8,1], index: 5, kind: input, shape index: {}]   ;;  %s1583_s6 = inlined_call_operand.vmem [shape: bf16[8,72], index: 6, kind: input, shape index: {}]   ;;  %s1584_s7 = inlined_call_operand.vmem [shape: f32[8,1], index: 7, kind: input, shape index: {}]   ;;  %s1585_s8 = inlined_call_operand.vmem [shape: f32[8,1], index: 8, kind: input, shape index: {}]   ;;  %s1586_s9 = inlined_call_operand.hbm [shape: f32[8,512], index: 9, kind: output, shape index: {}]  }
   0x1   :  { %15 = vsyncpa [#allocation6], 0 }
   0x2   :  { %16 = vsyncpa [#allocation4], 0  ;;  %s950_s30 = smov [#allocation2]   ;;  %s951_s11 = smov [#allocation5]  }
   0x3   :  { %s25_s10 = sshll.u32 %s950_s30, 4  ;;  %s34_s12 = sshll.u32 %s951_s11, 4  ;;  %s26_s10 = int_to_ptr.vmem [resolvable:$true] %s25_s10  ;;  %s35_s12 = int_to_ptr.vmem [resolvable:$true] %s34_s12 }
   0x4   :  { %s892_s13 = scalar_lea.vmem %s26_s10, 512  ;;  %p897_p1 = scmp.lt.s32.totalorder %s26_s10, %s26_s10 }
   0x5   :  { %p893_p0 = scmp.ne.s32.totalorder %s26_s10, %s892_s13  ;;  %p898_p2 = scmp.lt.s32.totalorder %s892_s13, %s892_s13 }
   0x7   :  { %p899_p3 = por %p898_p2, %p897_p1 }
   0x9   :  { %p900_p4 = pnand %p899_p3, %p893_p0 }
   0xb   :  { %903 = shalt.err (!%p900_p4)
}
   0xc   :  { %28 = dma.hbm_to_vmem [thread:$0]  %s1578_s1, 512, %s26_s10, [#allocation3]  }
   0xd   :  { %s912_s16 = scalar_lea.vmem %s35_s12, 1024  ;;  %p917_p6 = scmp.lt.s32.totalorder %s35_s12, %s35_s12 }
   0xe   :  { %p913_p5 = scmp.ne.s32.totalorder %s35_s12, %s912_s16  ;;  %p918_p7 = scmp.lt.s32.totalorder %s912_s16, %s912_s16 }
  0x10   :  { %p919_p8 = por %p918_p7, %p917_p6 }
  0x12   :  { %p920_p9 = pnand %p919_p8, %p913_p5 }
  0x14   :  { %923 = shalt.err (!%p920_p9)
}
  0x15   :  { %s952_s17 = smov 512   ;;  %s953_s18 = smov 32  }
  0x16   :  { %40 = dma.hbm_to_vmem [thread:$0]  %s1579_s2, 1024, %s35_s12, [#allocation6], %s952_s17, %s952_s17, %s953_s18  }
  0x17   :  { %944 = dma.done.wait [#allocation3], 512  }
  0x18   :  { %945 = vsyncadd [#allocation3], 4294966784 }
  0x19   :  { %946 = dma.done.wait [#allocation6], 1024  }
  0x1a   :  { %947 = vsyncadd [#allocation6], 4294966272  ;;  %v70_v0 = vld [vmem:[%s1577_s0 + $0x10] sm:$0xff]  ;;  %v68_v2 = vld [vmem:[%s1577_s0] sm:$0xff]  ;;  %s954_s2 = smov 111   ;;  %s955_s26 = smov 113   ;;  %v88_v13 = vlaneseq }
  0x1b   :  { %v74_v1 = vld [vmem:[#allocation2 + $0x10] sm:$0xff]  ;;  %v72_v4 = vld [vmem:[#allocation2] sm:$0xff]  ;;  %v69_v5 = vld [vmem:[%s1577_s0 + $0x8] sm:$0xff]  ;;  %s956_s29 = smov 112   ;;  %s958_s30 = smov 15   ;;  %v962_v12 = vmov 0  }
  0x1c   :  { %v1026_v3 = vadd.f32 %v74_v1, %v70_v0  ;;  %v73_v6 = vld [vmem:[#allocation2 + $0x8] sm:$0xff]  ;;  %v1031_v7 = vadd.f32 %v72_v4, %v68_v2  ;;  %v71_v9 = vld [vmem:[%s1577_s0 + $0x18] sm:$0xff]  ;;  %s957_s0 = smov 127   ;;  %s959_s10 = smov 1   ;;  %436 = vmatprep.mubr.bf16.mxu0 %v962_v12  ;;  %477 = vmatprep.mubr.bf16.mxu1 %v962_v12  ;;  %v1108_v14 = vand.u32 127, %v88_v13  ;;  %v1111_v17 = vshrl.u32 %v88_v13, 7 }
  0x1d   :  { %v1035_v8 = vadd.f32 %v73_v6, %v69_v5  ;;  %v75_v10 = vld [vmem:[#allocation2 + $0x18] sm:$0xff]  ;;  %s960_s11 = smov 17   ;;  %s961_s12 = smov 16   ;;  %878 = vset.pattern.permute.xlu0 %v962_v12  ;;  %879 = vset.pattern.permute.xlu1 %v962_v12  ;;  %v1113_v19 = vld [vmem:[#allocation5 + $0x20] ss:$0 sm:$0xff]  ;;  %v1125_v29 = vld [vmem:[#allocation5 + $0x8] sm:$0xff] }
  0x1e   :  { %337 = vrot.lane.b32.xlu1 %v1026_v3, %s954_s2  ;;  %333 = vrot.lane.b32.xlu0 %v1031_v7, %s954_s2  ;;  %v1048_v11 = vadd.f32 %v75_v10, %v71_v9  ;;  %vm341_vm0 = vcmp.lt.s32.totalorder %v1108_v14, 111  ;;  %v1115_v20 = vld [vmem:[#allocation5 + $0x28] ss:$0 sm:$0xff]  ;;  %v282_v25 = vsub.s32 6, %v1111_v17  ;;  %v315_v27 = vsub.s32 7, %v1111_v17  ;;  %v1141_v37 = vld [vmem:[#allocation5] sm:$0xff] }
  0x1f   :  { %vm391_vm1 = vcmask 1043456   ;;  %vm275_vm2 = vcmp.lt.s32.totalorder %v1108_v14, 113  ;;  %vm308_vm3 = vcmp.lt.s32.totalorder %v1108_v14, 112  ;;  %v1136_v35 = vld [vmem:[#allocation5 + $0x30] ss:$0 sm:$0xff]  ;;  %v1153_v44 = vsub.s32 4, %v1111_v17 }
  0x20   :  { %v1132_v33 = vrot.slane %v1125_v29, %v282_v25  ;;  %v1139_v36 = vrot.slane %v1125_v29, %v315_v27  ;;  %v1143_v38 = vld [vmem:[#allocation5 + $0x38] ss:$0 sm:$0xff]  ;;  %v1159_v47 = vrot.slane %v1141_v37, %v315_v27  ;;  %v1165_v51 = vrot.slane %v1141_v37, %v282_v25  ;;  %v1184_v1 = vld [vmem:[#allocation5 + $0x10] sm:$0xff]  ;;  %s963_s21 = smov [#allocation7]  }
  0x21   :  { %v249_v52 = vsub.s32 5, %v1111_v17  ;;  %v1172_v59 = vrot.slane %v1125_v29, %v1153_v44  ;;  %vm242_vm4 = vcmp.lt.s32.totalorder %v1108_v14, 127  ;;  %v1186_v2 = vld [vmem:[#allocation5 + $0x18] sm:$0xff]  ;;  %v1193_v13 = vrot.slane %v1184_v1, %v315_v27  ;;  %s842_s22 = sshll.u32 %s963_s21, 4  ;;  %s843_s22 = int_to_ptr.vmem [resolvable:$true] %s842_s22 }
  0x22   :  { %269 = vrot.lane.b32.xlu1 %v1035_v8, %s955_s26  ;;  %335 = vrot.lane.b32.xlu0 %v1035_v8, %s954_s2  ;;  %vm156_vm5 = vcmp.lt.s32.totalorder %v1108_v14, 15  ;;  %vm189_vm6 = vcmp.lt.s32.totalorder %v1108_v14, 1  ;;  %vm90_vm7 = vcmp.lt.s32.totalorder %v1108_v14, 17  ;;  %vm123_vm8 = vcmp.lt.s32.totalorder %v1108_v14, 16  ;;  %p929_p11 = scmp.lt.s32.totalorder %s843_s22, %s843_s22 }
  0x23   :  { %v1182_v0 = vrot.slane %v1125_v29, %v249_v52  ;;  %v231_v9 = vmul.f32 %v1172_v59, %v1035_v8  ;;  %vm387_vm9 = vcmask 588800  }
  0x26   :  { %302 = vrot.lane.b32.xlu1 %v1035_v8, %s956_s29  ;;  %271 = vrot.lane.b32.xlu0 %v1026_v3, %s955_s26 }
  0x2a   :  { %339 = vrot.lane.b32.xlu1 %v1048_v11, %s954_s2  ;;  %304 = vrot.lane.b32.xlu0 %v1026_v3, %s956_s29 }
  0x2e   :  { %300 = vrot.lane.b32.xlu1 %v1031_v7, %s956_s29  ;;  %267 = vrot.lane.b32.xlu0 %v1031_v7, %s955_s26 }
  0x32   :  { %238 = vrot.lane.b32.xlu1 %v1026_v3, %s957_s0  ;;  %236 = vrot.lane.b32.xlu0 %v1035_v8, %s957_s0 }
  0x36   :  { %306 = vrot.lane.b32.xlu1 %v1048_v11, %s956_s29  ;;  %273 = vrot.lane.b32.xlu0 %v1048_v11, %s955_s26 }
  0x3a   :  { %148 = vrot.lane.b32.xlu1 %v1031_v7, %s958_s30  ;;  %234 = vrot.lane.b32.xlu0 %v1031_v7, %s957_s0 }
  0x3e   :  { %181 = vrot.lane.b32.xlu1 %v1031_v7, %s959_s10  ;;  %150 = vrot.lane.b32.xlu0 %v1035_v8, %s958_s30 }
  0x42   :  { %240 = vrot.lane.b32.xlu1 %v1048_v11, %s957_s0  ;;  %183 = vrot.lane.b32.xlu0 %v1035_v8, %s959_s10 }
  0x46   :  { %187 = vrot.lane.b32.xlu1 %v1048_v11, %s959_s10  ;;  %154 = vrot.lane.b32.xlu0 %v1048_v11, %s958_s30 }
  0x4a   :  { %82 = vrot.lane.b32.xlu1 %v1035_v8, %s960_s11  ;;  %80 = vrot.lane.b32.xlu0 %v1031_v7, %s960_s11 }
  0x4e   :  { %117 = vrot.lane.b32.xlu1 %v1035_v8, %s961_s12  ;;  %115 = vrot.lane.b32.xlu0 %v1031_v7, %s961_s12 }
  0x52   :  { %185 = vrot.lane.b32.xlu1 %v1026_v3, %s959_s10  ;;  %152 = vrot.lane.b32.xlu0 %v1026_v3, %s958_s30 }
  0x56   :  { %121 = vrot.lane.b32.xlu1 %v1048_v11, %s961_s12  ;;  %86 = vrot.lane.b32.xlu0 %v1048_v11, %s960_s11 }
  0x5a   :  { %119 = vrot.lane.b32.xlu1 %v1026_v3, %s961_s12  ;;  %84 = vrot.lane.b32.xlu0 %v1026_v3, %s960_s11 }
  0x90   :  { %v338_v15 = vpop.permute.xlu1 %337  ;;  %v334_v16 = vpop.permute.xlu0 %333 }
  0x94   :  { %v270_v18 = vpop.permute.xlu1 %269  ;;  %v336_v21 = vpop.permute.xlu0 %335 }
  0x95   :  { %v343_v22 = vsel %vm341_vm0, %v336_v21, %v338_v15  ;;  %v344_v23 = vsel %vm341_vm0, %v334_v16, %v336_v21  ;;  %v1203_v21 = vrot.slane %v1186_v2, %v282_v25 }
  0x96   :  { %v362_v24 = vmul.f32 %v1113_v19, %v344_v23  ;;  %v363_v26 = vmul.f32 %v1115_v20, %v343_v22 }
  0x98   :  { %v303_v28 = vpop.permute.xlu1 %302  ;;  %v1128_v30 = vpop.permute.xlu0 %271  ;;  %v383_v31 = vpack.c.bf16 %v363_v26, %v363_v26  ;;  %v382_v32 = vpack.c.bf16 %v362_v24, %v362_v24 }
  0x99   :  { %v277_v39 = vsel %vm275_vm2, %v270_v18, %v1128_v30 }
  0x9a   :  { %856 = vmatprep.subr.msk.bf16.mxu0 %vm391_vm1, %v383_v31  ;;  %v393_v34 = vsel %vm391_vm1, %v382_v32, 0  ;;  %v297_v49 = vmul.f32 %v1132_v33, %v277_v39 }
  0x9b   :  { %411 = vmatpush1.bf16.msra.mxu0 %v393_v34 }
  0x9c   :  { %v340_v40 = vpop.permute.xlu1 %339  ;;  %v305_v43 = vpop.permute.xlu0 %304 }
  0x9d   :  { %v342_v41 = vsel %vm341_vm0, %v338_v15, %v340_v40  ;;  %v345_v42 = vsel %vm341_vm0, %v340_v40, %v334_v16  ;;  %v310_v46 = vsel %vm308_vm3, %v303_v28, %v305_v43  ;;  %v1196_v15 = vrot.slane %v1186_v2, %v315_v27 }
  0x9e   :  { %v364_v45 = vmul.f32 %v1136_v35, %v342_v41  ;;  %v365_v48 = vmul.f32 %v1143_v38, %v345_v42  ;;  %v330_v50 = vmul.f32 %v1139_v36, %v310_v46  ;;  %v1211_v27 = vrot.slane %v1141_v37, %v1153_v44 }
  0x9f   :  { %v1223_v40 = vrot.slane %v1141_v37, %v249_v52 }
  0xa0   :  { %v301_v53 = vpop.permute.xlu1 %300  ;;  %v385_v54 = vpack.c.bf16 %v365_v48, %v365_v48  ;;  %v384_v55 = vpack.c.bf16 %v364_v45, %v364_v45  ;;  %v268_v57 = vpop.permute.xlu0 %267  ;;  %v379_v58 = vpack.c.bf16 %v330_v50, %v297_v49  ;;  %v230_v46 = vmul.f32 %v1211_v27, %v1031_v7 }
  0xa1   :  { %v311_v56 = vsel %vm308_vm3, %v301_v53, %v303_v28  ;;  %v278_v61 = vsel %vm275_vm2, %v268_v57, %v270_v18  ;;  %v1200_v18 = vrot.slane %v1184_v1, %v282_v25  ;;  %v163_v49 = vsub.s32 2, %v1111_v17 }
  0xa2   :  { %v329_v60 = vmul.f32 %v1159_v47, %v311_v56  ;;  %858 = vmatprep.subr.msk.bf16.mxu1 %vm391_vm1, %v385_v54  ;;  %v399_v62 = vsel %vm391_vm1, %v384_v55, 0  ;;  %v296_v63 = vmul.f32 %v1165_v51, %v278_v61  ;;  %412 = vmatprep.subr.bf16.mxu0 %v379_v58  ;;  %v196_v50 = vsub.s32 3, %v1111_v17 }
  0xa3   :  { %452 = vmatpush1.bf16.msra.mxu1 %v399_v62  ;;  %v1234_v54 = vrot.slane %v1186_v2, %v1153_v44  ;;  %v1238_v55 = vrot.slane %v1184_v1, %v1153_v44  ;;  %v1247_v58 = vrot.slane %v1186_v2, %v249_v52 }
  0xa4   :  { %v239_v4 = vpop.permute.xlu1 %238  ;;  %v237_v5 = vpop.permute.xlu0 %236  ;;  %v378_v6 = vpack.c.bf16 %v329_v60, %v296_v63  ;;  %v1250_v60 = vrot.slane %v1125_v29, %v163_v49  ;;  %v1254_v44 = vrot.slane %v1125_v29, %v196_v50 }
  0xa5   :  { %v244_v10 = vsel %vm242_vm4, %v237_v5, %v239_v4  ;;  %v233_v63 = vmul.f32 %v1234_v54, %v1048_v11 }
  0xa6   :  { %v264_v16 = vmul.f32 %v1182_v0, %v244_v10  ;;  %413 = vmatpush1.bf16.msra.mxu0 %v378_v6 }
  0xa8   :  { %v307_v22 = vpop.permute.xlu1 %306  ;;  %v274_v24 = vpop.permute.xlu0 %273  ;;  %v375_v26 = vpack.c.bf16 %v264_v16, %v231_v9 }
  0xa9   :  { %v309_v8 = vsel %vm308_vm3, %v305_v43, %v307_v22  ;;  %v312_v23 = vsel %vm308_vm3, %v307_v22, %v301_v53  ;;  %v276_v25 = vsel %vm275_vm2, %v1128_v30, %v274_v24  ;;  %v279_v32 = vsel %vm275_vm2, %v274_v24, %v268_v57 }
  0xaa   :  { %v331_v28 = vmul.f32 %v1193_v13, %v309_v8  ;;  %v332_v31 = vmul.f32 %v1196_v15, %v312_v23  ;;  %v298_v34 = vmul.f32 %v1200_v18, %v276_v25  ;;  %v299_v39 = vmul.f32 %v1203_v21, %v279_v32  ;;  %414 = vmatprep.subr.bf16.mxu0 %v375_v26 }
  0xab   :  { %v1244_v57 = vrot.slane %v1184_v1, %v249_v52  ;;  %v232_v52 = vmul.f32 %v1238_v55, %v1026_v3  ;;  %v1272_v8 = vrot.slane %v1141_v37, %v196_v50 }
  0xac   :  { %v149_v41 = vpop.permute.xlu1 %148  ;;  %v235_v42 = vpop.permute.xlu0 %234  ;;  %v381_v43 = vpack.c.bf16 %v332_v31, %v299_v39  ;;  %v380_v45 = vpack.c.bf16 %v331_v28, %v298_v34 }
  0xad   :  { %v245_v30 = vsel %vm242_vm4, %v235_v42, %v237_v5 }
  0xae   :  { %v263_v48 = vmul.f32 %v1223_v40, %v245_v30  ;;  %453 = vmatprep.subr.bf16.mxu1 %v381_v43  ;;  %v130_v43 = vsub.s32 1, %v1111_v17 }
  0xaf   :  { %454 = vmatpush1.bf16.msra.mxu1 %v380_v45 }
  0xb0   :  { %v182_v53 = vpop.permute.xlu1 %181  ;;  %v1241_v7 = vpop.permute.xlu0 %150  ;;  %v374_v56 = vpack.c.bf16 %v263_v48, %v230_v46 }
  0xb1   :  { %v159_v61 = vsel %vm156_vm5, %v149_v41, %v1241_v7 }
  0xb2   :  { %415 = vmatpush1.bf16.msra.mxu0 %v374_v56  ;;  %v178_v11 = vmul.f32 %v1250_v60, %v159_v61 }
  0xb4   :  { %v241_v62 = vpop.permute.xlu1 %240  ;;  %v184_v9 = vpop.permute.xlu0 %183 }
  0xb5   :  { %v243_v5 = vsel %vm242_vm4, %v239_v4, %v241_v62  ;;  %v246_v6 = vsel %vm242_vm4, %v241_v62, %v235_v42  ;;  %v192_v22 = vsel %vm189_vm6, %v182_v53, %v184_v9  ;;  %v1277_v4 = vrot.slane %v1141_v37, %v163_v49 }
  0xb6   :  { %v265_v10 = vmul.f32 %v1244_v57, %v243_v5  ;;  %v266_v16 = vmul.f32 %v1247_v58, %v246_v6  ;;  %v211_v3 = vmul.f32 %v1254_v44, %v192_v22  ;;  %v97_v42 = vsub.s32 0, %v1111_v17 }
  0xb7   :  { %v1300_v62 = vrot.slane %v1184_v1, %v196_v50  ;;  %v1311_v6 = vrot.slane %v1186_v2, %v163_v49 }
  0xb8   :  { %v188_v23 = vpop.permute.xlu1 %187  ;;  %v377_v24 = vpack.c.bf16 %v266_v16, %v233_v63  ;;  %v376_v26 = vpack.c.bf16 %v265_v10, %v232_v52  ;;  %v155_v31 = vpop.permute.xlu0 %154  ;;  %v371_v25 = vpack.c.bf16 %v211_v3, %v178_v11  ;;  %v1289_v48 = vrot.slane %v1125_v29, %v97_v42 }
  0xb9   :  { %v193_v28 = vsel %vm189_vm6, %v188_v23, %v182_v53  ;;  %v160_v34 = vsel %vm156_vm5, %v155_v31, %v149_v41  ;;  %v1293_v41 = vrot.slane %v1125_v29, %v130_v43  ;;  %v1303_v63 = vrot.slane %v1186_v2, %v196_v50 }
  0xba   :  { %v210_v32 = vmul.f32 %v1272_v8, %v193_v28  ;;  %455 = vmatprep.subr.bf16.mxu1 %v377_v24  ;;  %v177_v39 = vmul.f32 %v1277_v4, %v160_v34  ;;  %416 = vmatprep.subr.bf16.mxu0 %v371_v25  ;;  %v1308_v29 = vrot.slane %v1184_v1, %v163_v49 }
  0xbb   :  { %456 = vmatpush1.bf16.msra.mxu1 %v376_v26  ;;  %v1318_v3 = vrot.slane %v1141_v37, %v130_v43  ;;  %v1330_v25 = vrot.slane %v1141_v37, %v97_v42 }
  0xbc   :  { %v83_v45 = vpop.permute.xlu1 %82  ;;  %v81_v46 = vpop.permute.xlu0 %80  ;;  %v370_v30 = vpack.c.bf16 %v210_v32, %v177_v39 }
  0xbd   :  { %v93_v53 = vsel %vm90_vm7, %v81_v46, %v83_v45 }
  0xbe   :  { %417 = vmatpush1.bf16.msra.mxu0 %v370_v30  ;;  %v112_v52 = vmul.f32 %v1289_v48, %v93_v53 }
  0xc0   :  { %v118_v56 = vpop.permute.xlu1 %117  ;;  %v116_v61 = vpop.permute.xlu0 %115 }
  0xc1   :  { %v126_v17 = vsel %vm123_vm8, %v116_v61, %v118_v56 }
  0xc2   :  { %v145_v5 = vmul.f32 %v1293_v41, %v126_v17  ;;  %v1338_v17 = vrot.slane %v1184_v1, %v130_v43 }
  0xc4   :  { %v186_v10 = vpop.permute.xlu1 %185  ;;  %v153_v11 = vpop.permute.xlu0 %152  ;;  %v367_v50 = vpack.c.bf16 %v145_v5, %v112_v52  ;;  %v1341_v52 = vrot.slane %v1186_v2, %v130_v43  ;;  %v1345_v5 = vrot.slane %v1184_v1, %v97_v42 }
  0xc5   :  { %v190_v16 = vsel %vm189_vm6, %v186_v10, %v188_v23  ;;  %v191_v22 = vsel %vm189_vm6, %v184_v9, %v186_v10  ;;  %v157_v49 = vsel %vm156_vm5, %v153_v11, %v155_v31  ;;  %v158_v28 = vsel %vm156_vm5, %v1241_v7, %v153_v11 }
  0xc6   :  { %v212_v24 = vmul.f32 %v1300_v62, %v191_v22  ;;  %v213_v26 = vmul.f32 %v1303_v63, %v190_v16  ;;  %v179_v23 = vmul.f32 %v1308_v29, %v158_v28  ;;  %v180_v9 = vmul.f32 %v1311_v6, %v157_v49  ;;  %418 = vmatprep.subr.bf16.mxu0 %v367_v50 }
  0xc8   :  { %v122_v32 = vpop.permute.xlu1 %121  ;;  %v87_v39 = vpop.permute.xlu0 %86  ;;  %v373_v30 = vpack.c.bf16 %v213_v26, %v180_v9  ;;  %v372_v53 = vpack.c.bf16 %v212_v24, %v179_v23 }
  0xc9   :  { %v127_v34 = vsel %vm123_vm8, %v122_v32, %v116_v61  ;;  %v94_v7 = vsel %vm90_vm7, %v87_v39, %v81_v46  ;;  %v1348_v61 = vrot.slane %v1186_v2, %v97_v42 }
  0xca   :  { %v144_v31 = vmul.f32 %v1318_v3, %v127_v34  ;;  %v111_v37 = vmul.f32 %v1330_v25, %v94_v7  ;;  %457 = vmatprep.subr.bf16.mxu1 %v373_v30 }
  0xcb   :  { %458 = vmatpush1.bf16.msra.mxu1 %v372_v53 }
  0xcc   :  { %v120_v10 = vpop.permute.xlu1 %119  ;;  %v85_v22 = vpop.permute.xlu0 %84  ;;  %v366_v43 = vpack.c.bf16 %v144_v31, %v111_v37 }
  0xcd   :  { %v124_v46 = vsel %vm123_vm8, %v120_v10, %v122_v32  ;;  %v125_v16 = vsel %vm123_vm8, %v118_v56, %v120_v10  ;;  %v91_v1 = vsel %vm90_vm7, %v85_v22, %v87_v39  ;;  %v92_v2 = vsel %vm90_vm7, %v83_v45, %v85_v22  ;;  %v386_v56 = vld [vmem:[%s1580_s3] sm:$0xf] }
  0xce   :  { %v146_v11 = vmul.f32 %v1338_v17, %v125_v16  ;;  %v147_v50 = vmul.f32 %v1341_v52, %v124_v46  ;;  %v113_v42 = vmul.f32 %v1345_v5, %v92_v2  ;;  %v114_v24 = vmul.f32 %v1348_v61, %v91_v1  ;;  %419 = vmatpush1.bf16.msra.mxu0 %v366_v43 }
  0xd0   :  { %v369_v26 = vpack.c.bf16 %v147_v50, %v114_v24  ;;  %v368_v49 = vpack.c.bf16 %v146_v11, %v113_v42 }
  0xd1   :  { %857 = vmatmul.mubr.msk.bf16.vlgmr.msra.gmra.mxu0 %vm387_vm9, %v386_v56 }
  0xd2   :  { %459 = vmatprep.subr.bf16.mxu1 %v369_v26  ;;  %734 = vmatprep.mubr.bf16.mxu0 %v962_v12 }
  0xd3   :  { %460 = vmatpush1.bf16.msra.mxu1 %v368_v49  ;;  %v505_v49 = vld [vmem:[%s1581_s4] sm:$0xff] }
  0xd6   :  { %859 = vmatmul.mubr.msk.bf16.vlgmr.msra.gmra.mxu1 %vm387_vm9, %v386_v56 }
  0xd7   :  { %775 = vmatprep.mubr.bf16.mxu1 %v962_v12 }
 0x191   :  { %v438_v45 = vpop.f32.mrf.mxu0 }
 0x192   :  { %v492_v28 = vmul.f32 %v438_v45, %v438_v45 }
 0x193   :  { %v440_v23 = vpop.f32.mrf.mxu0 }
 0x194   :  { %v486_v9 = vadd.f32 %v440_v23, %v438_v45  ;;  %v493_v32 = vmul.f32 %v440_v23, %v440_v23 }
 0x195   :  { %v442_v34 = vpop.f32.mrf.mxu0 }
 0x196   :  { %v479_v39 = vpop.f32.mrf.mxu1  ;;  %v496_v30 = vadd.f32 %v493_v32, %v492_v28  ;;  %v509_v32 = vld [vmem:[%s1582_s5] sm:$0xff] }
 0x197   :  { %v494_v53 = vmul.f32 %v479_v39, %v479_v39  ;;  %v443_v31 = vpop.f32.mrf.mxu0  ;;  %v487_v7 = vadd.f32 %v486_v9, %v479_v39 }
 0x198   :  { %v481_v37 = vpop.f32.mrf.mxu1 }
 0x199   :  { %v488_v10 = vadd.f32 %v487_v7, %v481_v37  ;;  %v495_v46 = vmul.f32 %v481_v37, %v481_v37  ;;  %v497_v16 = vadd.f32 %v496_v30, %v494_v53 }
 0x19a   :  { %v483_v22 = vpop.f32.mrf.mxu1 }
 0x19b   :  { %489 = vadd.xlane.f32.xlu0 %v488_v10  ;;  %v498_v43 = vadd.f32 %v497_v16, %v495_v46 }
 0x19c   :  { %v484_v11 = vpop.f32.mrf.mxu1 }
 0x19d   :  { %499 = vadd.xlane.f32.xlu1 %v498_v43 }
 0x224   :  { %v490_v12 = vpop.xlane.xlu0 %489 }
 0x225   :  { %v491_v50 = vmul.f32 0.001953125, %v490_v12 }
 0x226   :  { %v500_v1 = vpop.xlane.xlu1 %499 }
 0x227   :  { %v502_v2 = vmul.f32 %v491_v50, %v491_v50  ;;  %v501_v42 = vmul.f32 0.001953125, %v500_v1 }
 0x229   :  { %v503_v24 = vsub.f32 %v501_v42, %v502_v2 }
 0x22b   :  { %v504_v56 = vmax.f32 %v503_v24, 0.0 }
 0x22d   :  { %v506_v26 = vadd.f32 1e-05, %v504_v56 }
 0x22f   :  { %880 = vrsqrt.f32 %v506_v26 }
 0x23c   :  { %v881_v28 = vpop.eup %880 }
 0x23d   :  { %v508_v9 = vmul.f32 %v881_v28, %v505_v49 }
 0x23f   :  { %514 = vperm.xlu0 %878, %v508_v9   ;;  %v510_v34 = vmul.f32 %v508_v9, %v491_v50 }
 0x241   :  { %v511_v30 = vsub.f32 %v509_v32, %v510_v34 }
 0x243   :  { %523 = vperm.xlu1 %879, %v511_v30  }
 0x2ba   :  { %v515_v53 = vpop.permute.xlu0 %514 }
 0x2bb   :  { %v517_v31 = vmul.f32 %v515_v53, %v438_v45  ;;  %v519_v7 = vmul.f32 %v515_v53, %v479_v39  ;;  %v518_v46 = vmul.f32 %v515_v53, %v440_v23  ;;  %v520_v1 = vmul.f32 %v515_v53, %v481_v37 }
 0x2be   :  { %v524_v10 = vpop.permute.xlu1 %523 }
 0x2bf   :  { %v526_v16 = vadd.f32 %v524_v10, %v517_v31  ;;  %v528_v22 = vadd.f32 %v524_v10, %v519_v7  ;;  %v527_v43 = vadd.f32 %v524_v10, %v518_v46  ;;  %v529_v45 = vadd.f32 %v524_v10, %v520_v1 }
 0x2c1   :  { %v1375_v11 = vmax.f32 %v526_v16, 0.0  ;;  %v1377_v12 = vmax.f32 %v528_v22, 0.0  ;;  %v1383_v50 = vmax.f32 %v527_v43, 0.0  ;;  %v1393_v23 = vmax.f32 %v529_v45, 0.0 }
 0x2c3   :  { %638 = vrot.lane.b32.xlu0 %v1377_v12, %s956_s29  ;;  %650 = vrot.lane.b32.xlu1 %v1375_v11, %s954_s2 }
 0x2c7   :  { %618 = vrot.lane.b32.xlu0 %v1375_v11, %s955_s26  ;;  %652 = vrot.lane.b32.xlu1 %v1383_v50, %s954_s2 }
 0x2cb   :  { %604 = vrot.lane.b32.xlu0 %v1383_v50, %s957_s0  ;;  %654 = vrot.lane.b32.xlu1 %v1377_v12, %s954_s2 }
 0x2cf   :  { %624 = vrot.lane.b32.xlu0 %v1393_v23, %s955_s26  ;;  %620 = vrot.lane.b32.xlu1 %v1383_v50, %s955_s26 }
 0x2d3   :  { %602 = vrot.lane.b32.xlu0 %v1375_v11, %s957_s0  ;;  %622 = vrot.lane.b32.xlu1 %v1377_v12, %s955_s26 }
 0x2d7   :  { %568 = vrot.lane.b32.xlu0 %v1383_v50, %s958_s30  ;;  %636 = vrot.lane.b32.xlu1 %v1383_v50, %s956_s29 }
 0x2db   :  { %584 = vrot.lane.b32.xlu0 %v1383_v50, %s959_s10  ;;  %656 = vrot.lane.b32.xlu1 %v1393_v23, %s954_s2 }
 0x2df   :  { %572 = vrot.lane.b32.xlu0 %v1393_v23, %s958_s30  ;;  %634 = vrot.lane.b32.xlu1 %v1375_v11, %s956_s29 }
 0x2e3   :  { %534 = vrot.lane.b32.xlu0 %v1375_v11, %s960_s11  ;;  %606 = vrot.lane.b32.xlu1 %v1377_v12, %s957_s0 }
 0x2e7   :  { %550 = vrot.lane.b32.xlu0 %v1375_v11, %s961_s12  ;;  %640 = vrot.lane.b32.xlu1 %v1393_v23, %s956_s29 }
 0x2eb   :  { %570 = vrot.lane.b32.xlu0 %v1377_v12, %s958_s30  ;;  %566 = vrot.lane.b32.xlu1 %v1375_v11, %s958_s30 }
 0x2ef   :  { %540 = vrot.lane.b32.xlu0 %v1393_v23, %s960_s11  ;;  %582 = vrot.lane.b32.xlu1 %v1375_v11, %s959_s10 }
 0x2f3   :  { %538 = vrot.lane.b32.xlu0 %v1377_v12, %s960_s11  ;;  %608 = vrot.lane.b32.xlu1 %v1393_v23, %s957_s0 }
 0x2f7   :  { %588 = vrot.lane.b32.xlu1 %v1393_v23, %s959_s10 }
 0x2fb   :  { %536 = vrot.lane.b32.xlu1 %v1383_v50, %s960_s11 }
 0x2ff   :  { %552 = vrot.lane.b32.xlu1 %v1383_v50, %s961_s12 }
 0x303   :  { %586 = vrot.lane.b32.xlu1 %v1377_v12, %s959_s10 }
 0x307   :  { %556 = vrot.lane.b32.xlu1 %v1393_v23, %s961_s12 }
 0x30b   :  { %554 = vrot.lane.b32.xlu1 %v1377_v12, %s961_s12 }
 0x335   :  { %v639_v39 = vpop.permute.xlu0 %638  ;;  %v651_v37 = vpop.permute.xlu1 %650 }
 0x339   :  { %v619_v2 = vpop.permute.xlu0 %618  ;;  %v653_v42 = vpop.permute.xlu1 %652 }
 0x33a   :  { %v660_v24 = vsel %vm341_vm0, %v651_v37, %v653_v42 }
 0x33b   :  { %v662_v56 = vmul.f32 %v1113_v19, %v660_v24 }
 0x33d   :  { %v605_v26 = vpop.permute.xlu0 %604  ;;  %v655_v49 = vpop.permute.xlu1 %654  ;;  %v682_v9 = vpack.c.bf16 %v662_v56, %v662_v56 }
 0x33e   :  { %v659_v28 = vsel %vm341_vm0, %v653_v42, %v655_v49 }
 0x33f   :  { %v663_v32 = vmul.f32 %v1115_v20, %v659_v28  ;;  %v691_v31 = vsel %vm391_vm1, %v682_v9, 0 }
 0x341   :  { %v683_v34 = vpack.c.bf16 %v663_v32, %v663_v32  ;;  %v621_v30 = vpop.permute.xlu1 %620  ;;  %v625_v53 = vpop.permute.xlu0 %624 }
 0x343   :  { %860 = vmatprep.subr.msk.bf16.mxu0 %vm391_vm1, %v683_v34 }
 0x344   :  { %709 = vmatpush1.bf16.msra.mxu0 %v691_v31 }
 0x345   :  { %v623_v7 = vpop.permute.xlu1 %622  ;;  %v603_v10 = vpop.permute.xlu0 %602 }
 0x346   :  { %v627_v19 = vsel %vm275_vm2, %v621_v30, %v623_v7 }
 0x347   :  { %v631_v22 = vmul.f32 %v627_v19, %v1132_v33  ;;  %v628_v33 = vsel %vm275_vm2, %v619_v2, %v621_v30 }
 0x349   :  { %v637_v46 = vpop.permute.xlu1 %636  ;;  %v1465_v24 = vpop.permute.xlu0 %568 }
 0x34a   :  { %v643_v16 = vsel %vm308_vm3, %v637_v46, %v639_v39 }
 0x34b   :  { %v647_v20 = vmul.f32 %v643_v16, %v1139_v36 }
 0x34d   :  { %v657_v43 = vpop.permute.xlu1 %656  ;;  %v679_v1 = vpack.c.bf16 %v647_v20, %v631_v22  ;;  %v629_v22 = vsel %vm275_vm2, %v625_v53, %v619_v2  ;;  %v598_v20 = vmul.f32 %v1375_v11, %v1211_v27 }
 0x34e   :  { %v658_v45 = vsel %vm341_vm0, %v655_v49, %v657_v43  ;;  %v661_v42 = vsel %vm341_vm0, %v657_v43, %v651_v37  ;;  %v630_v49 = vmul.f32 %v628_v33, %v1165_v51  ;;  %v612_v37 = vsel %vm242_vm4, %v603_v10, %v605_v26 }
 0x34f   :  { %v664_v56 = vmul.f32 %v1136_v35, %v658_v45  ;;  %v665_v28 = vmul.f32 %v1143_v38, %v661_v42  ;;  %710 = vmatprep.subr.bf16.mxu0 %v679_v1  ;;  %v1479_v38 = vpop.permute.xlu0 %584  ;;  %v614_v16 = vmul.f32 %v612_v37, %v1223_v40  ;;  %v626_v43 = vsel %vm275_vm2, %v623_v7, %v625_v53 }
 0x351   :  { %v684_v9 = vpack.c.bf16 %v664_v56, %v664_v56  ;;  %v685_v36 = vpack.c.bf16 %v665_v28, %v665_v28  ;;  %v635_v32 = vpop.permute.xlu1 %634  ;;  %v674_v45 = vpack.c.bf16 %v614_v16, %v598_v20 }
 0x352   :  { %v644_v34 = vsel %vm308_vm3, %v635_v32, %v637_v46 }
 0x353   :  { %v646_v31 = vmul.f32 %v644_v34, %v1159_v47  ;;  %862 = vmatprep.subr.msk.bf16.mxu1 %vm391_vm1, %v685_v36  ;;  %v697_v35 = vsel %vm391_vm1, %v684_v9, 0  ;;  %v599_v47 = vmul.f32 %v1383_v50, %v1172_v59  ;;  %v633_v59 = vmul.f32 %v629_v22, %v1203_v21  ;;  %v573_v2 = vpop.permute.xlu0 %572 }
 0x354   :  { %750 = vmatpush1.bf16.msra.mxu1 %v697_v35  ;;  %v632_v50 = vmul.f32 %v626_v43, %v1200_v18  ;;  %v600_v34 = vmul.f32 %v1377_v12, %v1238_v55 }
 0x355   :  { %v678_v30 = vpack.c.bf16 %v646_v31, %v630_v49  ;;  %v607_v19 = vpop.permute.xlu1 %606 }
 0x356   :  { %v611_v46 = vsel %vm242_vm4, %v605_v26, %v607_v19 }
 0x357   :  { %v615_v51 = vmul.f32 %v611_v46, %v1182_v0  ;;  %711 = vmatpush1.bf16.msra.mxu0 %v678_v30  ;;  %v535_v56 = vpop.permute.xlu0 %534 }
 0x359   :  { %v641_v1 = vpop.permute.xlu1 %640  ;;  %v675_v40 = vpack.c.bf16 %v615_v51, %v599_v47 }
 0x35a   :  { %v642_v26 = vsel %vm308_vm3, %v639_v39, %v641_v1  ;;  %v645_v0 = vsel %vm308_vm3, %v641_v1, %v635_v32 }
 0x35b   :  { %v648_v42 = vmul.f32 %v642_v26, %v1193_v13  ;;  %v649_v27 = vmul.f32 %v645_v0, %v1196_v15  ;;  %712 = vmatprep.subr.bf16.mxu0 %v675_v40  ;;  %v551_v32 = vpop.permute.xlu0 %550 }
 0x35c   :  { %713 = vmatpush1.bf16.msra.mxu0 %v674_v45 }
 0x35d   :  { %v680_v11 = vpack.c.bf16 %v648_v42, %v632_v50  ;;  %v567_v53 = vpop.permute.xlu1 %566  ;;  %v681_v7 = vpack.c.bf16 %v649_v27, %v633_v59 }
 0x35e   :  { %v576_v39 = vsel %vm156_vm5, %v567_v53, %v1465_v24 }
 0x35f   :  { %751 = vmatprep.subr.bf16.mxu1 %v681_v7  ;;  %v579_v13 = vmul.f32 %v576_v39, %v1250_v60  ;;  %v601_v60 = vmul.f32 %v1393_v23, %v1234_v54  ;;  %v686_v39 = vld [vmem:[%s1583_s6] sm:$0xf] }
 0x360   :  { %752 = vmatpush1.bf16.msra.mxu1 %v680_v11 }
 0x361   :  { %v583_v21 = vpop.permute.xlu1 %582 }
 0x362   :  { %v592_v18 = vsel %vm189_vm6, %v583_v21, %v1479_v38 }
 0x363   :  { %v595_v15 = vmul.f32 %v592_v18, %v1254_v44  ;;  %v577_v44 = vsel %vm156_vm5, %v573_v2, %v567_v53 }
 0x365   :  { %v609_v28 = vpop.permute.xlu1 %608  ;;  %v671_v33 = vpack.c.bf16 %v595_v15, %v579_v13 }
 0x366   :  { %v610_v9 = vsel %vm242_vm4, %v607_v19, %v609_v28  ;;  %v613_v36 = vsel %vm242_vm4, %v609_v28, %v603_v10  ;;  %v578_v19 = vmul.f32 %v577_v44, %v1277_v4 }
 0x367   :  { %v616_v49 = vmul.f32 %v610_v9, %v1244_v57  ;;  %v617_v37 = vmul.f32 %v613_v36, %v1247_v58  ;;  %714 = vmatprep.subr.bf16.mxu0 %v671_v33  ;;  %v571_v57 = vpop.permute.xlu0 %570 }
 0x368   :  { %v575_v47 = vsel %vm156_vm5, %v1465_v24, %v571_v57 }
 0x369   :  { %v676_v31 = vpack.c.bf16 %v616_v49, %v600_v34  ;;  %v589_v35 = vpop.permute.xlu1 %588  ;;  %v677_v30 = vpack.c.bf16 %v617_v37, %v601_v60 }
 0x36a   :  { %v593_v10 = vsel %vm189_vm6, %v589_v35, %v583_v21 }
 0x36b   :  { %v594_v55 = vmul.f32 %v593_v10, %v1272_v8  ;;  %753 = vmatprep.subr.bf16.mxu1 %v677_v30  ;;  %v541_v46 = vpop.permute.xlu0 %540  ;;  %v574_v8 = vsel %vm156_vm5, %v571_v57, %v573_v2 }
 0x36c   :  { %754 = vmatpush1.bf16.msra.mxu1 %v676_v31  ;;  %v545_v24 = vsel %vm90_vm7, %v541_v46, %v535_v56 }
 0x36d   :  { %v670_v58 = vpack.c.bf16 %v594_v55, %v578_v19  ;;  %v537_v12 = vpop.permute.xlu1 %536 }
 0x36e   :  { %v544_v54 = vsel %vm90_vm7, %v535_v56, %v537_v12 }
 0x36f   :  { %715 = vmatpush1.bf16.msra.mxu0 %v670_v58  ;;  %v547_v51 = vmul.f32 %v544_v54, %v1289_v48  ;;  %v580_v48 = vmul.f32 %v575_v47, %v1308_v29  ;;  %v539_v26 = vpop.permute.xlu0 %538 }
 0x371   :  { %v553_v23 = vpop.permute.xlu1 %552 }
 0x372   :  { %v560_v16 = vsel %vm123_vm8, %v551_v32, %v553_v23 }
 0x373   :  { %v563_v4 = vmul.f32 %v560_v16, %v1293_v41  ;;  %v581_v41 = vmul.f32 %v574_v8, %v1311_v6  ;;  %v807_v16 = vld [vmem:[%s1585_s8] sm:$0xff] }
 0x375   :  { %v587_v22 = vpop.permute.xlu1 %586  ;;  %v667_v20 = vpack.c.bf16 %v563_v4, %v547_v51 }
 0x376   :  { %v590_v43 = vsel %vm189_vm6, %v587_v22, %v589_v35  ;;  %v591_v1 = vsel %vm189_vm6, %v1479_v38, %v587_v22  ;;  %v546_v38 = vmul.f32 %v545_v24, %v1330_v25 }
 0x377   :  { %v596_v40 = vmul.f32 %v591_v1, %v1300_v62  ;;  %v597_v45 = vmul.f32 %v590_v43, %v1303_v63  ;;  %716 = vmatprep.subr.bf16.mxu0 %v667_v20  ;;  %v542_v62 = vsel %vm90_vm7, %v539_v26, %v541_v46  ;;  %v543_v63 = vsel %vm90_vm7, %v537_v12, %v539_v26  ;;  %v803_v12 = vld [vmem:[%s1584_s7] sm:$0xff]  ;;  %s924_s7 = scalar_lea.vmem %s843_s22, 512 }
 0x378   :  { %v549_v25 = vmul.f32 %v542_v62, %v1348_v61  ;;  %p925_p10 = scmp.ne.s32.totalorder %s843_s22, %s924_s7  ;;  %p930_p12 = scmp.lt.s32.totalorder %s924_s7, %s924_s7 }
 0x379   :  { %v672_v0 = vpack.c.bf16 %v596_v40, %v580_v48  ;;  %v557_v59 = vpop.permute.xlu1 %556  ;;  %v673_v50 = vpack.c.bf16 %v597_v45, %v581_v41 }
 0x37a   :  { %v561_v2 = vsel %vm123_vm8, %v557_v59, %v551_v32  ;;  %p931_p13 = por %p930_p12, %p929_p11 }
 0x37b   :  { %v562_v29 = vmul.f32 %v561_v2, %v1318_v3  ;;  %755 = vmatprep.subr.bf16.mxu1 %v673_v50  ;;  %v548_v3 = vmul.f32 %v543_v63, %v1345_v5 }
 0x37c   :  { %756 = vmatpush1.bf16.msra.mxu1 %v672_v0  ;;  %p932_p0 = pnand %p931_p13, %p925_p10 }
 0x37d   :  { %v666_v6 = vpack.c.bf16 %v562_v29, %v546_v38  ;;  %v555_v42 = vpop.permute.xlu1 %554 }
 0x37e   :  { %v558_v27 = vsel %vm123_vm8, %v555_v42, %v557_v59  ;;  %v559_v11 = vsel %vm123_vm8, %v553_v23, %v555_v42 }
 0x37f   :  { %v564_v53 = vmul.f32 %v559_v11, %v1338_v17  ;;  %v565_v7 = vmul.f32 %v558_v27, %v1341_v52  ;;  %717 = vmatpush1.bf16.msra.mxu0 %v666_v6 }
 0x381   :  { %v668_v56 = vpack.c.bf16 %v564_v53, %v548_v3  ;;  %v669_v21 = vpack.c.bf16 %v565_v7, %v549_v25 }
 0x382   :  { %861 = vmatmul.mubr.msk.bf16.vlgmr.msra.gmra.mxu0 %vm387_vm9, %v686_v39 }
 0x383   :  { %757 = vmatprep.subr.bf16.mxu1 %v669_v21 }
 0x384   :  { %758 = vmatpush1.bf16.msra.mxu1 %v668_v56 }
 0x387   :  { %863 = vmatmul.mubr.msk.bf16.vlgmr.msra.gmra.mxu1 %vm387_vm9, %v686_v39 }
 0x442   :  { %v736_v14 = vpop.f32.mrf.mxu0 }
 0x443   :  { %v790_v61 = vmul.f32 %v736_v14, %v736_v14 }
 0x444   :  { %v738_v5 = vpop.f32.mrf.mxu0 }
 0x445   :  { %v784_v18 = vadd.f32 %v738_v5, %v736_v14  ;;  %v791_v17 = vmul.f32 %v738_v5, %v738_v5 }
 0x446   :  { %v740_v13 = vpop.f32.mrf.mxu0 }
 0x447   :  { %v777_v52 = vpop.f32.mrf.mxu1  ;;  %v794_v15 = vadd.f32 %v791_v17, %v790_v61 }
 0x448   :  { %v792_v28 = vmul.f32 %v777_v52, %v777_v52  ;;  %v741_v33 = vpop.f32.mrf.mxu0  ;;  %v785_v9 = vadd.f32 %v784_v18, %v777_v52 }
 0x449   :  { %v779_v36 = vpop.f32.mrf.mxu1 }
 0x44a   :  { %v786_v32 = vadd.f32 %v785_v9, %v779_v36  ;;  %v793_v34 = vmul.f32 %v779_v36, %v779_v36  ;;  %v795_v49 = vadd.f32 %v794_v15, %v792_v28 }
 0x44b   :  { %v781_v37 = vpop.f32.mrf.mxu1 }
 0x44c   :  { %787 = vadd.xlane.f32.xlu0 %v786_v32  ;;  %v796_v60 = vadd.f32 %v795_v49, %v793_v34 }
 0x44d   :  { %v782_v44 = vpop.f32.mrf.mxu1 }
 0x44e   :  { %797 = vadd.xlane.f32.xlu1 %v796_v60 }
 0x4d5   :  { %v788_v31 = vpop.xlane.xlu0 %787 }
 0x4d6   :  { %v789_v35 = vmul.f32 0.001953125, %v788_v31 }
 0x4d7   :  { %v798_v30 = vpop.xlane.xlu1 %797 }
 0x4d8   :  { %v800_v10 = vmul.f32 %v789_v35, %v789_v35  ;;  %v799_v19 = vmul.f32 0.001953125, %v798_v30 }
 0x4da   :  { %v801_v55 = vsub.f32 %v799_v19, %v800_v10 }
 0x4dc   :  { %v802_v57 = vmax.f32 %v801_v55, 0.0 }
 0x4de   :  { %v804_v58 = vadd.f32 1e-05, %v802_v57 }
 0x4e0   :  { %882 = vrsqrt.f32 %v804_v58 }
 0x4ed   :  { %v883_v54 = vpop.eup %882 }
 0x4ee   :  { %v806_v23 = vmul.f32 %v883_v54, %v803_v12 }
 0x4f0   :  { %812 = vperm.xlu0 %878, %v806_v23   ;;  %v808_v46 = vmul.f32 %v806_v23, %v789_v35 }
 0x4f2   :  { %v809_v51 = vsub.f32 %v807_v16, %v808_v46 }
 0x4f4   :  { %821 = vperm.xlu1 %879, %v809_v51  }
 0x56b   :  { %v813_v4 = vpop.permute.xlu0 %812 }
 0x56c   :  { %v815_v8 = vmul.f32 %v813_v4, %v736_v14  ;;  %v816_v47 = vmul.f32 %v813_v4, %v738_v5  ;;  %v817_v22 = vmul.f32 %v813_v4, %v777_v52  ;;  %v818_v20 = vmul.f32 %v813_v4, %v779_v36 }
 0x56f   :  { %v822_v43 = vpop.permute.xlu1 %821 }
 0x570   :  { %v824_v1 = vadd.f32 %v822_v43, %v815_v8  ;;  %v825_v48 = vadd.f32 %v822_v43, %v816_v47  ;;  %v826_v41 = vadd.f32 %v822_v43, %v817_v22  ;;  %v827_v40 = vadd.f32 %v822_v43, %v818_v20 }
 0x572   :  { %v828_v45 = vmax.f32 %v824_v1, 0.0  ;;  %v829_v24 = vmax.f32 %v825_v48, 0.0  ;;  %v830_v26 = vmax.f32 %v826_v41, 0.0  ;;  %v831_v0 = vmax.f32 %v827_v40, 0.0 }
 0x574   :  { %832 = vst [vmem:[#allocation7] sm:$0xff] %v828_v45  ;;  %833 = vst [vmem:[#allocation7 + $0x8] sm:$0xff] %v829_v24 }
 0x575   :  { %834 = vst [vmem:[#allocation7 + $0x10] sm:$0xff] %v830_v26  ;;  %835 = vst [vmem:[#allocation7 + $0x18] sm:$0xff] %v831_v0 }
 0x576   :  { %935 = shalt.err (!%p932_p0)
}
 0x577   :  { %845 = dma.vmem_to_hbm [thread:$0]  %s843_s22, 512, %s1586_s9, [#allocation4]  }
 0x578   :  { %948 = dma.done.wait [#allocation4], 512  }
 0x579   :  { %949 = vsyncadd [#allocation4], 4294966784 }
 0x57a   :  { %849 = vsyncpa [#allocation3], 1 }
 0x57b   :  { %850 = vsyncpa [#allocation6], 1 }
 0x57c   :  { %851 = vsyncpa [#allocation4], 1 }

</bundles_post_ra>
